<compile_context>
chip_gen: v6e
topology: v6e:2x2x1
jax: 0.10.0
libtpu: 0.0.40
codegen_flags: <defaults>
</compile_context>

<pallas_src>
import jax
import jax.numpy as jnp
from jax import lax
from jax.experimental import pallas as pl
from jax.experimental.pallas import tpu as pltpu


def _adaptive_rmsnorm_kernel(eps):
    def kernel(h_ref, w_ref, o_ref):
        # h_ref: (1, TS, H)   w_ref: (1, 1, H) f32   o_ref: (1, TS, H)
        # Variance computed directly from the input buffer; no full f32 tile
        # is kept live across the reduction.
        var = jnp.mean(jnp.square(h_ref[0].astype(jnp.float32)),
                       axis=-1, keepdims=True)                     # (TS, 1)
        inv = lax.rsqrt(var + eps)                                  # (TS, 1)
        w = w_ref[0]                                                # (1, H) f32
        o_ref[0] = (w * (h_ref[0].astype(jnp.float32) * inv)).astype(o_ref.dtype)

    return kernel


def _device_vmem_bytes():
    """Physical VMEM per core, with a conservative fallback (v7x per-TC)."""
    phys = 64 << 20
    try:
        info = pltpu.get_tpu_info()
        for attr in ("vmem_capacity_bytes", "vmem_bytes", "vmem_capacity"):
            v = getattr(info, attr, None)
            if v:
                phys = int(v)
                break
    except Exception:
        pass
    return phys


def _plan_tiling(B, S, H, itemsize):
    """Pick the sequence tile TS and the scoped-VMEM limit to request."""
    phys = _device_vmem_bytes()
    # Scoped VMEM limit we request: generous, but with headroom vs physical.
    #   v7x (64 MiB physical per TC) -> 40 MiB; v5e/v6e (128 MiB) -> 64 MiB.
    scoped_limit = int(min((phys * 5) // 8, 64 << 20))

    # Per-step footprint per row of TS:
    #   2x double-buffered input blocks + 2x output blocks (4 * itemsize/elem)
    #   + ~4 bytes/elem allowance for the live f32 intermediate in the body.
    per_row = H * (4 * itemsize + 4)
    budget = (scoped_limit * 3) // 4          # headroom inside the scoped limit
    ts = max(8, budget // per_row)
    ts = min(int(ts), S)

    # Ensure >= 4 grid steps: gives the 2 TensorCores on v7x an even split and
    # the auto-pipeline something to overlap (cheap on 1-TC chips).
    min_steps = 4
    steps = B * (-(-S // ts))
    if steps < min_steps:
        need = -(-min_steps // B)             # tiles wanted along sequence axis
        ts = max(8, -(-S // need))
        ts = min(ts, S)

    # Prefer a tile that divides S (multiple of 8), avoiding a ragged/masked
    # last tile; otherwise fall back to a multiple of 8 (Pallas masks the tail).
    if ts < S:
        cand = max(8, (ts // 8) * 8)
        div = 0
        for t in range(8, min(cand, S) + 1, 8):
            if S % t == 0:
                div = t
        ts = div if div else cand
    return int(ts), scoped_limit


def llama_adaptive_rmsnorm(hidden_states, cond_embedding, w_t, bias, eps=1e-6):
    """hidden_states: (B, S, H); cond_embedding: (B, D); w_t: (D, H); bias: (H,)."""
    B, S, H = hidden_states.shape

    # Adaptive weight hoisted out of the kernel: one small XLA matmul on the
    # MXU (nn.Linear: cond @ W^T + bias), pre-cast to f32 so the kernel does
    # no per-step weight astype, reshaped to (B, 1, H) for a legal BlockSpec.
    weight = (cond_embedding.astype(jnp.float32) @ w_t.astype(jnp.float32)
              + bias.astype(jnp.float32))                     # (B, H) f32
    weight = weight.reshape(B, 1, H)                          # (B, 1, H)

    ts, vmem_limit = _plan_tiling(B, S, H, jnp.dtype(hidden_states.dtype).itemsize)
    grid = (B, pl.cdiv(S, ts))

    return pl.pallas_call(
        _adaptive_rmsnorm_kernel(eps),
        out_shape=jax.ShapeDtypeStruct((B, S, H), hidden_states.dtype),
        grid_spec=pltpu.PrefetchScalarGridSpec(
            num_scalar_prefetch=0,
            grid=grid,
            in_specs=[
                # hidden-state tile: H (reduction axis) kept whole per block
                pl.BlockSpec((1, ts, H), lambda b, s: (b, s, 0)),
                # per-batch adaptive weight row; reused across the whole s axis
                pl.BlockSpec((1, 1, H), lambda b, s: (b, 0, 0)),
            ],
            out_specs=pl.BlockSpec((1, ts, H), lambda b, s: (b, s, 0)),
        ),
        compiler_params=pltpu.CompilerParams(
            dimension_semantics=("parallel", "parallel"),
            vmem_limit_bytes=vmem_limit,
        ),
    )(hidden_states, weight)


def _reference(hidden_states, cond_embedding, w_t, bias, eps=1e-6):
    x = hidden_states.astype(jnp.float32)
    var = jnp.mean(x * x, axis=-1, keepdims=True)
    normed = x * lax.rsqrt(var + eps)
    weight = cond_embedding.astype(jnp.float32) @ w_t.astype(jnp.float32) + bias
    weight = weight[:, None, :]                               # unsqueeze(1)
    return (weight * normed).astype(hidden_states.dtype)


if __name__ == "__main__":
    B, S, H, D = 2, 64, 256, 128
    eps = 1e-6

    key = jax.random.PRNGKey(0)
    k_h, k_c, k_w = jax.random.split(key, 3)

    hidden_states = jax.random.normal(k_h, (B, S, H), dtype=jnp.float32)
    cond_embedding = jax.random.normal(k_c, (B, D), dtype=jnp.float32)

    # Parameters of nn.Linear(dim_cond, hidden_size): weight (H, D), bias (H,).
    # The module initializes weight=0, bias=1; we use a small deterministic
    # random weight instead so the adaptive-weight path is actually exercised.
    w = 0.02 * jax.random.normal(k_w, (H, D), dtype=jnp.float32)  # torch layout (H, D)
    bias = jnp.ones((H,), dtype=jnp.float32)
    w_t = w.T  # (D, H), so cond @ w_t == cond @ weight.T

    out = llama_adaptive_rmsnorm(hidden_states, cond_embedding, w_t, bias, eps)
    out = jax.block_until_ready(out)

    ref = _reference(hidden_states, cond_embedding, w_t, bias, eps)
    assert out.shape == (B, S, H) and out.dtype == hidden_states.dtype
    assert jnp.allclose(out, ref, atol=1e-5, rtol=1e-5), "mismatch vs reference"

    print("KERNEL_OK")
</pallas_src>

<mosaic_0001>
module attributes {stable_mosaic.version = 11 : i64} {
  func.func @kernel(%arg0: i32, %arg1: i32, %arg2: memref<1x32x256xf32, #tpu.memory_space<vmem>>, %arg3: memref<1x1x256xf32, #tpu.memory_space<vmem>>, %arg4: memref<1x32x256xf32, #tpu.memory_space<vmem>>) attributes {dimension_semantics = [#tpu.dimension_semantics<parallel>, #tpu.dimension_semantics<parallel>], iteration_bounds = array<i64: 2, 2>, scalar_prefetch = 0 : i64, scratch_operands = 0 : i64, tpu.core_type = #tpu.core_type<tc>, window_params = [{transform_indices = @transform_0, window_bounds = array<i64: 1, 32, 256>}, {transform_indices = @transform_1, window_bounds = array<i64: 1, 1, 256>}, {transform_indices = @transform_2, window_bounds = array<i64: 1, 32, 256>}]} {
    %c0 = arith.constant 0 : index
    %c0_0 = arith.constant 0 : index
    %c0_1 = arith.constant 0 : index
    %0 = vector.load %arg2[%c0, %c0_0, %c0_1] : memref<1x32x256xf32, #tpu.memory_space<vmem>>, vector<1x32x256xf32>
    %1 = vector.shape_cast %0 : vector<1x32x256xf32> to vector<32x256xf32>
    %2 = arith.mulf %1, %1 : vector<32x256xf32>
    %cst = arith.constant dense<0.000000e+00> : vector<32xf32>
    %3 = vector.multi_reduction <add>, %2, %cst [1] : vector<32x256xf32> to vector<32xf32>
    %4 = vector.shape_cast %3 : vector<32xf32> to vector<32x1xf32>
    %cst_2 = arith.constant 2.560000e+02 : f32
    %5 = vector.broadcast %cst_2 : f32 to vector<32x1xf32>
    %6 = arith.divf %4, %5 : vector<32x1xf32>
    %cst_3 = arith.constant 9.99999997E-7 : f32
    %7 = vector.broadcast %cst_3 : f32 to vector<32x1xf32>
    %8 = arith.addf %6, %7 : vector<32x1xf32>
    %9 = math.rsqrt %8 : vector<32x1xf32>
    %c0_4 = arith.constant 0 : index
    %c0_5 = arith.constant 0 : index
    %c0_6 = arith.constant 0 : index
    %10 = vector.load %arg3[%c0_4, %c0_5, %c0_6] : memref<1x1x256xf32, #tpu.memory_space<vmem>>, vector<1x1x256xf32>
    %11 = vector.shape_cast %10 : vector<1x1x256xf32> to vector<1x256xf32>
    %c0_7 = arith.constant 0 : index
    %c0_8 = arith.constant 0 : index
    %c0_9 = arith.constant 0 : index
    %12 = vector.load %arg2[%c0_7, %c0_8, %c0_9] : memref<1x32x256xf32, #tpu.memory_space<vmem>>, vector<1x32x256xf32>
    %13 = vector.shape_cast %12 : vector<1x32x256xf32> to vector<32x256xf32>
    %14 = vector.broadcast %9 : vector<32x1xf32> to vector<32x256xf32>
    %15 = arith.mulf %13, %14 : vector<32x256xf32>
    %16 = vector.broadcast %11 : vector<1x256xf32> to vector<32x256xf32>
    %17 = arith.mulf %16, %15 : vector<32x256xf32>
    %c0_10 = arith.constant 0 : index
    %c0_11 = arith.constant 0 : index
    %c0_12 = arith.constant 0 : index
    %18 = vector.load %arg4[%c0_10, %c0_11, %c0_12] : memref<1x32x256xf32, #tpu.memory_space<vmem>>, vector<1x32x256xf32>
    %19 = vector.shape_cast %18 : vector<1x32x256xf32> to vector<32x256xf32>
    %20 = vector.shape_cast %17 : vector<32x256xf32> to vector<1x32x256xf32>
    tpu.vector_store %arg4[%c0_10, %c0_11, %c0_12], %20 {strides = array<i32>} : memref<1x32x256xf32, #tpu.memory_space<vmem>>, vector<1x32x256xf32>,
    return
  }
  func.func @transform_0(%arg0: i32, %arg1: i32) -> (i32, i32, i32) {
    %c0_i32 = arith.constant 0 : i32
    %c0_i32_0 = arith.constant 0 : i32
    return %arg0, %arg1, %c0_i32 : i32, i32, i32
  }
  func.func @transform_1(%arg0: i32, %arg1: i32) -> (i32, i32, i32) {
    %c0_i32 = arith.constant 0 : i32
    %c0_i32_0 = arith.constant 0 : i32
    %c0_i32_1 = arith.constant 0 : i32
    return %arg0, %c0_i32, %c0_i32_0 : i32, i32, i32
  }
  func.func @transform_2(%arg0: i32, %arg1: i32) -> (i32, i32, i32) {
    %c0_i32 = arith.constant 0 : i32
    %c0_i32_0 = arith.constant 0 : i32
    return %arg0, %arg1, %c0_i32 : i32, i32, i32
  }
}

</mosaic_0001>

<bundles_post_ra>
// kernel: tpu_custom_call.1
= control target key start
LH: loop header
LB: loop body
LE: loop exit
PB: predicated region body
PF: predicated region fallthrough
CT: control target
= control target key end

     0   :  { %s1038_s0 = inlined_call_operand.hbm [shape: f32[2,64,256], index: 0, kind: input, shape index: {}]   ;;  %s1039_s1 = inlined_call_operand.hbm [shape: f32[2,1,256], index: 1, kind: input, shape index: {}]   ;;  %s1040_s2 = inlined_call_operand.hbm [shape: f32[2,64,256], index: 2, kind: output, shape index: {}]  }
   0x1   :  { %1047 = sst [smem:[#allocation14_spill]] %s1038_s0 }
   0x2   :  { %7 = vsyncpa [#allocation3], 0 }
   0x3   :  { %9 = vsyncpa [#allocation3 + $0x1], 0 }
   0x4   :  { %10 = vsyncpa [#allocation6], 0 }
   0x5   :  { %12 = vsyncpa [#allocation6 + $0x1], 0 }
   0x6   :  { %13 = vsyncpa [#allocation4], 0 }
   0x7   :  { %15 = vsyncpa [#allocation4 + $0x1], 0  ;;  %s777_s9 = smov 0   ;;  %s779_s10 = smov 0  }
   0x8   :  { %s781_s11 = smov 0   ;;  %s783_s12 = smov 0  }
   0x9   :  { %s785_s13 = smov 0   ;;  %s787_s14 = smov 0  }
   0xa   :  { %s789_s15 = smov 0   ;;  %s791_s16 = smov 0  }
   0xb   :  { %s793_s17 = smov 0   ;;  %s795_s18 = smov 0  }
   0xc   :  { %s797_s19 = smov 0  }
   0xd LB: > { %s429_s20 = sadd.s32 4294967294, %s753_s19   ;;  %s30_s21 = sadd.s32 1, %s745_s17  ;;  %s753_s19 = sphi %s797_s19, %s21_s19   ;;  %s749_s18 = sphi %s795_s18, %s1076_s18   ;;  %s745_s17 = sphi %s793_s17, %s1075_s17   ;;  %s741_s16 = sphi %s791_s16, %s1074_s16   ;;  %s737_s15 = sphi %s789_s15, %s1073_s15   ;;  %s733_s14 = sphi %s787_s14, %s1072_s14   ;;  %s729_s13 = sphi %s785_s13, %s1071_s13   ;;  %s725_s12 = sphi %s783_s12, %s1070_s12   ;;  %s721_s11 = sphi %s781_s11, %s1069_s11   ;;  %s717_s10 = sphi %s779_s10, %s1068_s10   ;;  %s713_s9 = sphi %s777_s9, %s1067_s9  }
   0xe   : > { %p31_p0 = scmp.ge.s32.totalorder %s30_s21, 2  ;;  %s33_s22 = sadd.s32 1, %s749_s18 }
   0xf   : > { %s42_s23 = sadd.s32 1, %s733_s14  ;;  %p1044_p1 = scmp.ne.s32.totalorder %s733_s14, %s729_s13 }
  0x10   : > { %s1078_s21 = smov (%p31_p0, %s30_s21), 0  ;;  %s1080_s22 = smov (!%p31_p0, %s33_s22), %s749_s18 }
  0x11   : > { %1048 = sst [smem:[#allocation11_spill]] %s1078_s21  ;;  %s38_s24 = ssub.s32 %s745_s17, %s1078_s21 }
  0x12   : > { %p50_p2 = scmp.eq.s32.totalorder %s753_s19, 0  ;;  %p35_p3 = scmp.ge.s32.totalorder %s1080_s22, 2 }
  0x13   : > { %p55_p4 = scmp.ne.s32.totalorder %s729_s13, %s725_s12  ;;  %p113_p6 = scmp.eq.s32.totalorder %s429_s20, 3 }
  0x14   : > { %p851_p5 = por %p50_p2, %p1044_p1  ;;  %s1082_s22 = smov (%p35_p3, %s1080_s22), 0 }
  0x15   : > { %1050 = sst [smem:[#allocation12_spill]] %s1082_s22  ;;  %p860_p7 = por %p113_p6, %p55_p4 }
  0x16   : > { %s866_s27 = ssub.s32 %s749_s18, %s1082_s22  ;;  %p1045_p8 = scmp.lt.s32.totalorder %s753_s19, 4 }
  0x17   : > { %s1051_s26 = scalar_select %p860_p7, 1, 0 }
  0x18   : > { %s39_s28 = sor.u32 %s38_s24, %s866_s27  ;;  %s133_s29 = sand.u32 1, %s733_s14  }
  0x19   : > { %1052 = sst [smem:[#allocation13_spill]] %s1051_s26  ;;  %p40_p9 = scmp.eq.s32.totalorder %s39_s28, 0 }
  0x1a   : > { %s432_s30 = sshll.u32 %s133_s29, 6  ;;  %s451_s3 = sshll.u32 %s745_s17, 3 }
  0x1b   : > { %s873_s4 = scalar_select %p40_p9, %s733_s14, %s42_s23  }
  0x1c   : > { %s435_s5 = sshll.u32 %s749_s18, 4  ;;  %s137_s7 = scalar_lea.vmem [#allocation2], %s432_s30 }
  0x1d   : > { %s144_s6 = sadd.s32 %s451_s3, %s435_s5  ;;  %s147_s8 = sshll.u32 %s137_s7, 4  ;;  %s148_s8 = int_to_ptr.vmem [resolvable:$true] %s147_s8 }
  0x1e   : > { %s436_s20 = sshll.u32 %s144_s6, 7  ;;  %s1053_s0 = sld [smem:[#allocation14_spill]] }
  0x1f   : > { %p883_p10 = pnand %p1045_p8, %p851_p5  ;;  %p440_p11 = scmp.ge.s32.totalorder %s753_s19, 1 }
  0x20   : > { %s134_s23 = scalar_lea.sflag [#allocation3], %s133_s29  ;;  %s586_s28 = scalar_lea.vmem %s148_s8, 1024 }
  0x21   : > { %p575_p12 = pneg %p883_p10  ;;  %p587_p13 = scmp.ne.s32.totalorder %s148_s8, %s586_s28 }
  0x22   : > { %s755_s30 = smov [#allocation2]  }
  0x23   : > { %p589_p0 = pnand %p587_p13, %p575_p12  ;;  %s591_s3 = sshll.u32 %s755_s30, 4  ;;  %s592_s3 = int_to_ptr.vmem [resolvable:$false] %s591_s3 }
  0x24   : > { %s146_s22 = scalar_lea.hbm %s1053_s0, %s436_s20  ;;  %s593_s21 = scalar_lea.vmem %s592_s3, 2048 }
  0x25   : > { %p590_p3 = pneg %p589_p0  ;;  %p594_p6 = scmp.lt.s32.totalorder %s148_s8, %s592_s3 }
  0x26   : > { %p595_p9 = scmp.lt.s32.totalorder %s593_s21, %s586_s28 }
  0x28   : > { %p596_p1 = por %p595_p9, %p594_p6 }
  0x2a   : > { %p597_p5 = pnand %p596_p1, %p590_p3 }
  0x2c   : > { %600 = shalt.err (!%p597_p5)
}
  0x2d   : > { %s756_s25 = smov 256   ;;  %s757_s26 = smov 16  }
  0x2e   : > { %463 = dma.hbm_to_vmem [thread:$0]  (!%p883_p10), %s146_s22, 1024, %s148_s8, %s134_s23, %s756_s25, %s756_s25, %s757_s26  }
  0x2f   : > { %p174_p1 = scmp.lt.s32.totalorder %s753_s19, 5  ;;  %s428_s5 = sadd.s32 4294967295, %s753_s19  }
  0x30   : > { %p66_p13 = scmp.eq.s32.totalorder %s866_s27, 0  ;;  %p56_p0 = scmp.eq.s32.totalorder %s428_s5, 0 }
  0x31   : > { %p895_p12 = pnand %p440_p11, %p174_p1  ;;  %s68_s6 = sadd.s32 1, %s721_s11 }
  0x32   : > { %s903_s7 = scalar_select %p66_p13, %s721_s11, %s68_s6  }
  0x33   : > { %p908_p3 = por %p56_p0, %p55_p4  ;;  %p75_p10 = scmp.ne.s32.totalorder %s721_s11, %s717_s10 }
  0x34   : > { %p81_p6 = scmp.ne.s32.totalorder %s717_s10, %s713_s9  ;;  %p107_p9 = scmp.eq.s32.totalorder %s428_s5, 3 }
  0x35   : > { %p77_p11 = por %p75_p10, %p50_p2  ;;  %s157_s22 = sand.u32 1, %s721_s11  }
  0x36   : > { %p919_p5 = por %p81_p6, %p56_p0  ;;  %p1058_p1 = scmp.ne.s32.totalorder %s733_s14, %s729_s13 }
  0x37   : > { %s437_s24 = sshll.u32 %s157_s22, 1  ;;  %s452_s23 = sshll.u32 %s749_s18, 5 }
  0x38   : > { %p926_p8 = por %p107_p9, %p1058_p1  ;;  %s167_s3 = scalar_lea.hbm %s1039_s1, %s452_s23 }
  0x39   : > { %s161_s9 = scalar_lea.vmem [#allocation5], %s437_s24  ;;  %p1060_p2 = scmp.lt.s32.totalorder %s753_s19, 4 }
  0x3a   : > { %s1059_s27 = scalar_select %p926_p8, 1, 0 }
  0x3b   : > { %s169_s21 = sshll.u32 %s161_s9, 4  ;;  %p936_p4 = pnand %p1060_p2, %p77_p11  ;;  %s170_s21 = int_to_ptr.vmem [resolvable:$true] %s169_s21 }
  0x3c   : > { %s158_s26 = scalar_lea.sflag [#allocation6], %s157_s22  ;;  %s614_s5 = scalar_lea.vmem %s170_s21, 32 }
  0x3d   : > { %p603_p13 = pneg %p936_p4  ;;  %p615_p0 = scmp.ne.s32.totalorder %s170_s21, %s614_s5 }
  0x3e   : > { %s758_s6 = smov [#allocation5]  }
  0x3f   : > { %p617_p10 = pnand %p615_p0, %p603_p13  ;;  %s619_s0 = sshll.u32 %s758_s6, 4  ;;  %s620_s0 = int_to_ptr.vmem [resolvable:$false] %s619_s0 }
  0x40   : > { %s621_s23 = scalar_lea.vmem %s620_s0, 64  ;;  %p622_p9 = scmp.lt.s32.totalorder %s170_s21, %s620_s0 }
  0x41   : > { %p618_p6 = pneg %p617_p10  ;;  %p623_p1 = scmp.lt.s32.totalorder %s621_s23, %s614_s5 }
  0x43   : > { %p624_p7 = por %p623_p1, %p622_p9 }
  0x45   : > { %p625_p8 = pnand %p624_p7, %p618_p6 }
  0x47   : > { %628 = shalt.err (!%p625_p8)
}
  0x48   : > { %466 = dma.hbm_to_vmem [thread:$0]  (!%p936_p4), %s167_s3, 32, %s170_s21, %s158_s26  }
  0x49   : > { %178 = sbr.rel (%p895_p12) target bundleno = 267 (0x10b), region = 28  ;;  %s947_s22 = sand.u32 (!%p895_p12), 1, %s729_s13  }
  0x4a   : > { %s441_s24 = sshll.u32 (!%p895_p12), %s947_s22, 6  ;;  %s181_s28 = scalar_lea.sflag (!%p895_p12), [#allocation3], %s947_s22 }
  0x4b   : > { %s184_s0 = scalar_lea.vmem (!%p895_p12), [#allocation2], %s441_s24 }
  0x4e   : > { %700 = dma.done.wait (%p908_p3), %s181_s28, 1024  }
  0x4f   : > { %702 = vsyncadd (%p908_p3), %s181_s28, 4294966272  ;;  %s189_s29 = sand.u32 1, %s717_s10  }
  0x50   : > { %s958_s30 = sshll.u32 %s189_s29, 1  ;;  %s190_s3 = scalar_lea.sflag [#allocation6], %s189_s29 }
  0x51   : > { %s193_s9 = scalar_lea.vmem [#allocation5], %s958_s30 }
  0x52   : > { %704 = dma.done.wait (%p919_p5), %s190_s3, 32  }
  0x53   : > { %706 = vsyncadd (%p919_p5), %s190_s3, 4294967264  ;;  %v225_v0 = vld [vmem:[%s184_s0 + $0x20] sm:$0xff]  ;;  %v226_v1 = vld [vmem:[%s184_s0 + $0x28] sm:$0xff]  ;;  %v272_v27 = vlaneseq  ;;  %s453_s20 = sshll.u32 %s737_s15, 3  ;;  %s447_s8 = sshll.u32 %s741_s16, 4 }
  0x54   : > { %v221_v2 = vld [vmem:[%s184_s0] sm:$0xff]  ;;  %v233_v3 = vmul.f32 %v225_v0, %v225_v0  ;;  %v234_v4 = vmul.f32 %v226_v1, %v226_v1  ;;  %v222_v5 = vld [vmem:[%s184_s0 + $0x8] sm:$0xff]  ;;  %v227_v7 = vld [vmem:[%s184_s0 + $0x30] sm:$0xff]  ;;  %s312_s21 = sadd.s32 %s453_s20, %s447_s8  ;;  %s218_s26 = scalar_lea.vmem [#allocation7], %s441_s24 }
  0x55   : > { %v229_v6 = vmul.f32 %v221_v2, %v221_v2  ;;  %v228_v8 = vld [vmem:[%s184_s0 + $0x38] sm:$0xff]  ;;  %v230_v9 = vmul.f32 %v222_v5, %v222_v5  ;;  %v235_v10 = vmul.f32 %v227_v7, %v227_v7  ;;  %v223_v12 = vld [vmem:[%s184_s0 + $0x10] sm:$0xff]  ;;  %v273_v33 = vshrl.u32 %v272_v27, 7  ;;  %v262_v36 = vld [vmem:[%s193_s9] sm:$0x3]  ;;  %s448_s25 = sshll.u32 %s312_s21, 7 }
  0x56   : > { %v236_v11 = vmul.f32 %v228_v8, %v228_v8  ;;  %v224_v13 = vld [vmem:[%s184_s0 + $0x18] sm:$0xff]  ;;  %v243_v14 = vadd.f32 %v234_v4, %v233_v3  ;;  %v231_v15 = vmul.f32 %v223_v12, %v223_v12  ;;  %s315_s15 = sshll.u32 %s218_s26, 4  ;;  %s974_s6 = scalar_lea.hbm %s1040_s2, %s448_s25  ;;  %s976_s15 = int_to_ptr.vmem [resolvable:$true] %s315_s15 }
  0x57   : > { %v232_v16 = vmul.f32 %v224_v13, %v224_v13  ;;  %v237_v17 = vadd.f32 %v230_v9, %v229_v6  ;;  %v274_v34 = vsub.s32 0, %v273_v33  ;;  %v278_v35 = vsub.s32 1, %v273_v33  ;;  %s299_s23 = scalar_lea.sflag [#allocation4], %s947_s22  ;;  %s629_s24 = scalar_lea.vmem %s976_s15, 1024 }
  0x58   : > { %244 = vadd.xlane.f32.xlu1 %v243_v14  ;;  %v246_v18 = vadd.f32 %v236_v11, %v235_v10  ;;  %p630_p7 = scmp.ne.s32.totalorder %s976_s15, %s629_s24  ;;  %p1062_p8 = scmp.ne.s32.totalorder %s1059_s27, 0 }
  0x59   : > { %238 = vadd.xlane.f32.xlu0 %v237_v17  ;;  %v240_v19 = vadd.f32 %v232_v16, %v231_v15  ;;  %v275_v37 = vrot.slane %v262_v36, %v274_v34  ;;  %v279_v38 = vrot.slane %v262_v36, %v278_v35  ;;  %s759_s28 = smov [#allocation7]  }
  0x5a   : > { %p631_p12 = pnand %p630_p7, %p1062_p8  ;;  %s633_s0 = sshll.u32 %s759_s28, 4  ;;  %s634_s0 = int_to_ptr.vmem [resolvable:$false] %s633_s0 }
  0x5b   : > { %s635_s29 = scalar_lea.vmem %s634_s0, 2048  ;;  %p636_p11 = scmp.lt.s32.totalorder %s976_s15, %s634_s0 }
  0x5c   : > { %247 = vadd.xlane.f32.xlu1 %v246_v18  ;;  %p632_p3 = pneg %p631_p12  ;;  %p637_p5 = scmp.lt.s32.totalorder %s635_s29, %s629_s24 }
  0x5d   : > { %241 = vadd.xlane.f32.xlu0 %v240_v19 }
  0x5e   : > { %p638_p2 = por %p637_p5, %p636_p11 }
  0x60   : > { %p639_p4 = pnand %p638_p2, %p632_p3 }
  0xe1   : > { %v245_v20 = vpop.xlane.xlu1 %244 }
  0xe2   : > { %v252_v21 = vmul.f32 0.00390625, %v245_v20  ;;  %v239_v22 = vpop.xlane.xlu0 %238 }
  0xe3   : > { %v250_v23 = vmul.f32 0.00390625, %v239_v22 }
  0xe4   : > { %v256_v24 = vadd.f32 1e-06, %v252_v21 }
  0xe5   : > { %v254_v25 = vadd.f32 1e-06, %v250_v23  ;;  %v248_v26 = vpop.xlane.xlu1 %247 }
  0xe6   : > { %565 = vrsqrt.f32 %v256_v24  ;;  %v253_v28 = vmul.f32 0.00390625, %v248_v26  ;;  %v242_v29 = vpop.xlane.xlu0 %241 }
  0xe7   : > { %567 = vrsqrt.f32 %v254_v25  ;;  %v251_v30 = vmul.f32 0.00390625, %v242_v29 }
  0xe8   : > { %v257_v31 = vadd.f32 1e-06, %v253_v28 }
  0xe9   : > { %v255_v32 = vadd.f32 1e-06, %v251_v30 }
  0xea   : > { %569 = vrsqrt.f32 %v257_v31 }
  0xeb   : > { %571 = vrsqrt.f32 %v255_v32 }
  0xf3   : > { %v566_v39 = vpop.eup %565 }
  0xf4   : > { %v568_v40 = vpop.eup %567  ;;  %v267_v41 = vmul.f32 %v566_v39, %v225_v0  ;;  %v268_v42 = vmul.f32 %v566_v39, %v226_v1 }
  0xf5   : > { %v263_v43 = vmul.f32 %v568_v40, %v221_v2  ;;  %v264_v44 = vmul.f32 %v568_v40, %v222_v5 }
  0xf6   : > { %v286_v45 = vmul.f32 %v275_v37, %v267_v41  ;;  %v287_v46 = vmul.f32 %v279_v38, %v268_v42 }
  0xf7   : > { %v570_v47 = vpop.eup %569  ;;  %v282_v48 = vmul.f32 %v275_v37, %v263_v43  ;;  %v283_v49 = vmul.f32 %v279_v38, %v264_v44 }
  0xf8   : > { %v572_v50 = vpop.eup %571  ;;  %294 = vst [vmem:[%s218_s26 + $0x20] sm:$0xff] %v286_v45  ;;  %295 = vst [vmem:[%s218_s26 + $0x28] sm:$0xff] %v287_v46  ;;  %v269_v51 = vmul.f32 %v570_v47, %v227_v7  ;;  %v270_v52 = vmul.f32 %v570_v47, %v228_v8 }
  0xf9   : > { %290 = vst [vmem:[%s218_s26] sm:$0xff] %v282_v48  ;;  %291 = vst [vmem:[%s218_s26 + $0x8] sm:$0xff] %v283_v49  ;;  %v265_v53 = vmul.f32 %v572_v50, %v223_v12  ;;  %v266_v54 = vmul.f32 %v572_v50, %v224_v13 }
  0xfa   : > { %v288_v55 = vmul.f32 %v275_v37, %v269_v51  ;;  %v289_v56 = vmul.f32 %v279_v38, %v270_v52 }
  0xfb   : > { %v284_v57 = vmul.f32 %v275_v37, %v265_v53  ;;  %v285_v58 = vmul.f32 %v279_v38, %v266_v54 }
  0xfc   : > { %296 = vst [vmem:[%s218_s26 + $0x30] sm:$0xff] %v288_v55  ;;  %297 = vst [vmem:[%s218_s26 + $0x38] sm:$0xff] %v289_v56 }
  0xfd   : > { %292 = vst [vmem:[%s218_s26 + $0x10] sm:$0xff] %v284_v57  ;;  %293 = vst [vmem:[%s218_s26 + $0x18] sm:$0xff] %v285_v58 }
  0xfe   : > { %642 = shalt.err (!%p639_p4)
}
  0xff   : > { %s643_s30 = scalar_lea.hbm %s974_s6, 1024  ;;  %s647_s20 = scalar_lea.hbm %s1040_s2, 4096 }
 0x100   : > { %p644_p13 = scmp.ne.s32.totalorder %s974_s6, %s643_s30  ;;  %p648_p6 = scmp.lt.s32.totalorder %s974_s6, %s1040_s2 }
 0x101   : > { %p649_p9 = scmp.lt.s32.totalorder %s647_s20, %s643_s30 }
 0x102   : > { %p645_p0 = pnand %p644_p13, %p1062_p8 }
 0x103   : > { %p650_p1 = por %p649_p9, %p648_p6 }
 0x104   : > { %p646_p10 = pneg %p645_p0 }
 0x106   : > { %p651_p7 = pnand %p650_p1, %p646_p10 }
 0x108   : > { %654 = shalt.err (!%p651_p7)
}
 0x109   : > { %s760_s25 = smov 256   ;;  %s761_s26 = smov 16  }
 0x10a   : > { %458 = dma.vmem_to_hbm [thread:$0]  (%p1062_p8), %s976_s15, 1024, %s974_s6, %s299_s23, %s760_s25, %s760_s25, %s761_s26  }
 0x10b PF: > { %s1063_s16 = sld [smem:[#allocation13_spill]]  ;;  %p472_p12 = scmp.ge.s32.totalorder %s753_s19, 2 }
 0x10c   : > { %s330_s5 = sand.u32 1, %s725_s12  }
 0x10d   : > { %s331_s24 = scalar_lea.sflag [#allocation4], %s330_s5 }
 0x111   : > { %p1064_p3 = scmp.ne.s32.totalorder %s1063_s16, 0 }
 0x113   : > { %p468_p11 = pnand %p472_p12, %p1064_p3 }
 0x115   : > { %p469_p5 = pneg %p468_p11 }
 0x117   : > { %708 = dma.done.wait (%p469_p5), %s331_s24, 1024  }
 0x118   : > { %710 = vsyncadd (%p469_p5), %s331_s24, 4294966272  ;;  %s21_s19 = sadd.s32 1, %s753_s19   ;;  %s1065_s27 = sld [smem:[#allocation11_spill]] }
 0x119   : > { %p18_p2 = scmp.ge.s32.totalorder %s21_s19, 6   ;;  %s1066_s22 = sld [smem:[#allocation12_spill]] }
 0x11a   : > { %s1067_s9 = smov %s717_s10  ;;  %s1068_s10 = smov %s721_s11 }
 0x11b   : > { %s1069_s11 = smov %s903_s7  ;;  %s1070_s12 = smov %s729_s13 }
 0x11c   : > { %s1071_s13 = smov %s733_s14  ;;  %s1072_s14 = smov %s873_s4 }
 0x11d   : > { %s1073_s15 = smov %s745_s17  ;;  %s1074_s16 = smov %s749_s18 }
 0x11e   : > { %s1075_s17 = smov %s1065_s27  ;;  %20 = sbr.rel (!%p18_p2) target bundleno = 13 (0xd), region = 86 }
 0x11f   : > { %s1076_s18 = smov %s1066_s22 }
 0x123   :  { %336 = vsyncpa [#allocation3], 1 }
 0x124   :  { %338 = vsyncpa [#allocation3 + $0x1], 1 }
 0x125   :  { %339 = vsyncpa [#allocation6], 1 }
 0x126   :  { %341 = vsyncpa [#allocation6 + $0x1], 1 }
 0x127   :  { %342 = vsyncpa [#allocation4], 1 }
 0x128   :  { %344 = vsyncpa [#allocation4 + $0x1], 1 }

</bundles_post_ra>
